<compile_context>
chip_gen: v5e
topology: v5e:2x2
jax: 0.10.0
libtpu: 0.0.40
codegen_flags: <defaults>
</compile_context>

<pallas_src>
import functools

import jax
import jax.numpy as jnp
from jax.experimental import pallas as pl
from jax.experimental.pallas import tpu as pltpu

# Scoped-VMEM limit: above the 16/32 MiB defaults, below v7x's 64 MiB physical.
_VMEM_LIMIT = 48 * 1024 * 1024


def _round_up(x, m):
    return ((x + m - 1) // m) * m


# --------------------------------------------------------------------------
# 1. T5LayerNorm (RMSNorm)
# --------------------------------------------------------------------------
def _t5_layernorm_kernel(x_ref, w_ref, o_ref, *, eps, inv_h):
    x = x_ref[...]                                   # (TM, H)
    xf = x.astype(jnp.float32)
    # variance = mean(x^2): sum on the XLU, fused compile-time 1/H, rsqrt on the EUP.
    ss = jnp.sum(xf * xf, axis=-1, keepdims=True)    # (TM, 1)
    inv = jax.lax.rsqrt(ss * inv_h + eps)            # (TM, 1)
    out = w_ref[...].astype(jnp.float32) * (xf * inv)
    o_ref[...] = out.astype(o_ref.dtype)


def _pick_tile_rows(R, H, itemsize, *, max_tile=2048,
                    vmem_budget_bytes=32 * 1024 * 1024):
    # ~2x double-buffered input + 2x double-buffered output + fp32 in-kernel temps.
    per_row = H * (4 * itemsize + 8)
    tm = vmem_budget_bytes // max(per_row, 1)
    tm = min(tm, max_tile, _round_up(R, 8))
    tm = max(8, (tm // 8) * 8)
    return tm


def t5_layer_norm(hidden_states, weight, eps=1e-6, *, tile_rows=None):
    """T5-style RMS LayerNorm: no mean subtraction, no bias, fp32 variance."""
    orig_shape = hidden_states.shape
    H = orig_shape[-1]
    x2d = hidden_states.reshape(-1, H)
    R = x2d.shape[0]

    itemsize = jnp.dtype(hidden_states.dtype).itemsize
    tm = tile_rows if tile_rows is not None else _pick_tile_rows(R, H, itemsize)
    tm = min(tm, _round_up(R, 8))
    tm = max(8, (tm // 8) * 8)

    w2d = weight.reshape(1, H)
    kernel = functools.partial(_t5_layernorm_kernel, eps=eps, inv_h=1.0 / H)

    # No host-side pad/unpad: grid uses cdiv and Pallas masks the partial edge
    # block (rows are independent, so garbage tail rows are never written back).
    out = pl.pallas_call(
        kernel,
        out_shape=jax.ShapeDtypeStruct((R, H), hidden_states.dtype),
        grid_spec=pltpu.PrefetchScalarGridSpec(
            num_scalar_prefetch=0,
            grid=(pl.cdiv(R, tm),),
            in_specs=[
                pl.BlockSpec((tm, H), lambda i: (i, 0)),
                pl.BlockSpec((1, H), lambda i: (0, 0)),   # weight: constant block
            ],
            out_specs=pl.BlockSpec((tm, H), lambda i: (i, 0)),
        ),
        compiler_params=pltpu.CompilerParams(
            dimension_semantics=("parallel",),
            vmem_limit_bytes=_VMEM_LIMIT),
    )(x2d, w2d)
    return out.reshape(orig_shape)


# --------------------------------------------------------------------------
# 2. Linear projections (bias-free), optionally fused with the residual add
# --------------------------------------------------------------------------
def _matmul_kernel(a_ref, b_ref, o_ref):
    o_ref[...] = jnp.dot(a_ref[...], b_ref[...],
                         preferred_element_type=jnp.float32).astype(o_ref.dtype)


def _matmul_residual_kernel(a_ref, b_ref, r_ref, o_ref):
    y = jnp.dot(a_ref[...], b_ref[...], preferred_element_type=jnp.float32)
    # TODO(synk): training-mode nn.Dropout on the attention output is stochastic;
    # inference (eval) semantics -> identity, so the residual add is fused here.
    o_ref[...] = (r_ref[...].astype(jnp.float32) + y).astype(o_ref.dtype)


def _linear(x2d, w, residual=None, *, tile_m=256, tile_n=256):
    """y = x2d @ w (+ residual).  x2d: (M, K), w: (K, N)."""
    M, K = x2d.shape
    _, N = w.shape
    tm = min(tile_m, _round_up(M, 8))
    tm = max(8, (tm // 8) * 8)
    tn = N if N <= tile_n else tile_n               # tile_n is a multiple of 128

    in_specs = [
        pl.BlockSpec((tm, K), lambda i, j: (i, 0)),
        pl.BlockSpec((K, tn), lambda i, j: (0, j)),
    ]
    args = [x2d, w]
    if residual is not None:
        in_specs.append(pl.BlockSpec((tm, tn), lambda i, j: (i, j)))
        args.append(residual)
        kernel = _matmul_residual_kernel
    else:
        kernel = _matmul_kernel

    return pl.pallas_call(
        kernel,
        out_shape=jax.ShapeDtypeStruct((M, N), x2d.dtype),
        grid_spec=pltpu.PrefetchScalarGridSpec(
            num_scalar_prefetch=0,
            grid=(pl.cdiv(M, tm), pl.cdiv(N, tn)),
            in_specs=in_specs,
            out_specs=pl.BlockSpec((tm, tn), lambda i, j: (i, j)),
        ),
        compiler_params=pltpu.CompilerParams(
            dimension_semantics=("parallel", "parallel"),
            vmem_limit_bytes=_VMEM_LIMIT),
    )(*args)


# --------------------------------------------------------------------------
# 3. Attention core: per (batch*head) scores + fp32 softmax + context
# --------------------------------------------------------------------------
def _t5_attn_core_kernel(q_ref, k_ref, v_ref, b_ref, o_ref):
    q = q_ref[...].astype(jnp.float32)               # (Lq, dk)
    k = k_ref[...].astype(jnp.float32)               # (Lk, dk)
    v = v_ref[...]                                   # (Lk, dk)

    # T5: no 1/sqrt(d_kv) scaling (folded into weight init).
    scores = jax.lax.dot_general(
        q, k, dimension_numbers=(((1,), (1,)), ((), ())),
        preferred_element_type=jnp.float32)          # (Lq, Lk)
    scores = scores + b_ref[...].astype(jnp.float32)

    m = jnp.max(scores, axis=-1, keepdims=True)
    e = jnp.exp(scores - m)
    p = e / jnp.sum(e, axis=-1, keepdims=True)       # fp32 softmax
    p = p.astype(v.dtype)                            # cast back like torch .type_as

    o_ref[...] = jnp.dot(p, v,
                         preferred_element_type=jnp.float32).astype(o_ref.dtype)


def _attention_core(q, k, v, bias):
    """q: (BH, Lq, dk), k/v: (BH, Lk, dk), bias: (BH, Lq, Lk) -> (BH, Lq, dk)."""
    BH, Lq, dk = q.shape
    _, Lk, _ = k.shape
    return pl.pallas_call(
        _t5_attn_core_kernel,
        out_shape=jax.ShapeDtypeStruct((BH, Lq, dk), q.dtype),
        grid_spec=pltpu.PrefetchScalarGridSpec(
            num_scalar_prefetch=0,
            grid=(BH,),
            in_specs=[
                pl.BlockSpec((None, Lq, dk), lambda i: (i, 0, 0)),
                pl.BlockSpec((None, Lk, dk), lambda i: (i, 0, 0)),
                pl.BlockSpec((None, Lk, dk), lambda i: (i, 0, 0)),
                pl.BlockSpec((None, Lq, Lk), lambda i: (i, 0, 0)),
            ],
            out_specs=pl.BlockSpec((None, Lq, dk), lambda i: (i, 0, 0)),
        ),
        compiler_params=pltpu.CompilerParams(
            dimension_semantics=("parallel",),
            vmem_limit_bytes=_VMEM_LIMIT),
    )(q, k, v, bias)


# --------------------------------------------------------------------------
# 4. Full T5LayerCrossAttention forward
# --------------------------------------------------------------------------
def t5_layer_cross_attention(hidden_states, key_value_states, params,
                             attention_mask=None, position_bias=None,
                             eps=1e-6):
    """Returns (layer_output, present_key_value_state=None, position_bias)."""
    B, Lq, d_model = hidden_states.shape
    _, Lk, _ = key_value_states.shape
    n_heads, d_kv = params["n_heads"], params["d_kv"]
    inner = n_heads * d_kv
    dtype = hidden_states.dtype

    # 1) RMSNorm
    normed = t5_layer_norm(hidden_states, params["layer_norm_weight"], eps=eps)

    # 2) Q / K / V projections (bias-free linears on the MXU)
    q2d = _linear(normed.reshape(B * Lq, d_model), params["wq"])          # (B*Lq, inner)
    k2d = _linear(key_value_states.reshape(B * Lk, d_model), params["wk"])
    v2d = _linear(key_value_states.reshape(B * Lk, d_model), params["wv"])

    def split_heads(x2d, L):
        return (x2d.reshape(B, L, n_heads, d_kv)
                   .transpose(0, 2, 1, 3)
                   .reshape(B * n_heads, L, d_kv))

    qh, kh, vh = split_heads(q2d, Lq), split_heads(k2d, Lk), split_heads(v2d, Lk)

    # 3) position_bias: no relative-attention bias in cross-attention -> zeros (+ mask)
    if position_bias is None:
        position_bias = jnp.zeros((1, n_heads, Lq, Lk), dtype=dtype)
        if attention_mask is not None:
            position_bias = position_bias + attention_mask.astype(dtype)
    bias = jnp.broadcast_to(position_bias, (B, n_heads, Lq, Lk)).reshape(
        B * n_heads, Lq, Lk)

    # 4) Attention core
    ctx = _attention_core(qh, kh, vh, bias)                               # (B*H, Lq, d_kv)
    ctx2d = (ctx.reshape(B, n_heads, Lq, d_kv)
                .transpose(0, 2, 1, 3)
                .reshape(B * Lq, inner))

    # 5) Output projection fused with the residual add (dropout = identity in eval)
    layer_output = _linear(ctx2d, params["wo"],
                           residual=hidden_states.reshape(B * Lq, d_model))
    layer_output = layer_output.reshape(B, Lq, d_model)

    # TODO(synk): past_key_value / use_cache incremental-decoding path and
    # layer_head_mask are not implemented (defaults None / False in the spec).
    return layer_output, None, position_bias


# --------------------------------------------------------------------------
# Reference (plain JAX, mirrors the torch forward in eval mode)
# --------------------------------------------------------------------------
def _reference(hidden, enc, params, eps):
    n_heads, d_kv = params["n_heads"], params["d_kv"]
    B, Lq, D = hidden.shape
    Lk = enc.shape[1]
    with jax.default_matmul_precision("highest"):
        var = jnp.mean(hidden.astype(jnp.float32) ** 2, axis=-1, keepdims=True)
        normed = params["layer_norm_weight"] * (hidden * jax.lax.rsqrt(var + eps))
        q = (normed @ params["wq"]).reshape(B, Lq, n_heads, d_kv).transpose(0, 2, 1, 3)
        k = (enc @ params["wk"]).reshape(B, Lk, n_heads, d_kv).transpose(0, 2, 1, 3)
        v = (enc @ params["wv"]).reshape(B, Lk, n_heads, d_kv).transpose(0, 2, 1, 3)
        scores = jnp.einsum("bhqd,bhkd->bhqk", q, k)
        p = jax.nn.softmax(scores.astype(jnp.float32), axis=-1).astype(scores.dtype)
        ctx = jnp.einsum("bhqk,bhkd->bhqd", p, v).transpose(0, 2, 1, 3)
        ctx = ctx.reshape(B, Lq, n_heads * d_kv)
        attn_out = ctx @ params["wo"]
    return hidden + attn_out


if __name__ == "__main__":
    key = jax.random.PRNGKey(0)
    batch, q_len, kv_len = 2, 8, 8
    d_model, n_heads, d_kv = 64, 4, 16
    inner = n_heads * d_kv
    eps = 1e-6

    keys = jax.random.split(key, 6)
    hidden = jax.random.normal(keys[0], (batch, q_len, d_model), dtype=jnp.float32)
    enc = jax.random.normal(keys[1], (batch, kv_len, d_model), dtype=jnp.float32)
    scale = 0.05
    params = {
        "layer_norm_weight": jnp.ones((d_model,), jnp.float32),  # T5 inits LN weight to 1
        "wq": scale * jax.random.normal(keys[2], (d_model, inner), jnp.float32),
        "wk": scale * jax.random.normal(keys[3], (d_model, inner), jnp.float32),
        "wv": scale * jax.random.normal(keys[4], (d_model, inner), jnp.float32),
        "wo": scale * jax.random.normal(keys[5], (inner, d_model), jnp.float32),
        "n_heads": n_heads,
        "d_kv": d_kv,
    }

    layer_output, _, pos_bias = t5_layer_cross_attention(
        hidden, enc, params, attention_mask=None, position_bias=None, eps=eps)
    layer_output = jax.block_until_ready(layer_output)

    ref = _reference(hidden, enc, params, eps)

    assert layer_output.shape == hidden.shape
    assert layer_output.dtype == hidden.dtype
    assert pos_bias.shape == (1, n_heads, q_len, kv_len)
    assert jnp.allclose(layer_output, ref, atol=5e-4, rtol=5e-4), (
        float(jnp.max(jnp.abs(layer_output - ref))))

    print("KERNEL_OK")
</pallas_src>

<mosaic_0001>
module attributes {stable_mosaic.version = 11 : i64} {
  func.func @_t5_layernorm_kernel(%arg0: i32, %arg1: memref<16x64xf32, #tpu.memory_space<vmem>>, %arg2: memref<1x64xf32, #tpu.memory_space<vmem>>, %arg3: memref<16x64xf32, #tpu.memory_space<vmem>>) attributes {dimension_semantics = [#tpu.dimension_semantics<parallel>], iteration_bounds = array<i64: 1>, scalar_prefetch = 0 : i64, scratch_operands = 0 : i64, tpu.core_type = #tpu.core_type<tc>, window_params = [{transform_indices = @transform_0, window_bounds = array<i64: 16, 64>}, {pipeline_mode = #tpu.pipeline_mode<synchronous>, transform_indices = @transform_1, window_bounds = array<i64: 1, 64>}, {transform_indices = @transform_2, window_bounds = array<i64: 16, 64>}]} {
    %c0 = arith.constant 0 : index
    %c0_0 = arith.constant 0 : index
    %0 = vector.load %arg1[%c0, %c0_0] : memref<16x64xf32, #tpu.memory_space<vmem>>, vector<16x64xf32>
    %1 = arith.mulf %0, %0 : vector<16x64xf32>
    %cst = arith.constant dense<0.000000e+00> : vector<16xf32>
    %2 = vector.multi_reduction <add>, %1, %cst [1] : vector<16x64xf32> to vector<16xf32>
    %3 = vector.shape_cast %2 : vector<16xf32> to vector<16x1xf32>
    %cst_1 = arith.constant 1.562500e-02 : f32
    %4 = vector.broadcast %cst_1 : f32 to vector<16x1xf32>
    %5 = arith.mulf %3, %4 : vector<16x1xf32>
    %cst_2 = arith.constant 9.99999997E-7 : f32
    %6 = vector.broadcast %cst_2 : f32 to vector<16x1xf32>
    %7 = arith.addf %5, %6 : vector<16x1xf32>
    %8 = math.rsqrt %7 : vector<16x1xf32>
    %c0_3 = arith.constant 0 : index
    %c0_4 = arith.constant 0 : index
    %9 = vector.load %arg2[%c0_3, %c0_4] : memref<1x64xf32, #tpu.memory_space<vmem>>, vector<1x64xf32>
    %10 = vector.broadcast %8 : vector<16x1xf32> to vector<16x64xf32>
    %11 = arith.mulf %0, %10 : vector<16x64xf32>
    %12 = vector.broadcast %9 : vector<1x64xf32> to vector<16x64xf32>
    %13 = arith.mulf %12, %11 : vector<16x64xf32>
    %c0_5 = arith.constant 0 : index
    %c0_6 = arith.constant 0 : index
    %14 = vector.load %arg3[%c0_5, %c0_6] : memref<16x64xf32, #tpu.memory_space<vmem>>, vector<16x64xf32>
    tpu.vector_store %arg3[%c0_5, %c0_6], %13 {strides = array<i32>} : memref<16x64xf32, #tpu.memory_space<vmem>>, vector<16x64xf32>,
    return
  }
  func.func @transform_0(%arg0: i32) -> (i32, i32) {
    %c0_i32 = arith.constant 0 : i32
    %c0_i32_0 = arith.constant 0 : i32
    return %arg0, %c0_i32 : i32, i32
  }
  func.func @transform_1(%arg0: i32) -> (i32, i32) {
    %c0_i32 = arith.constant 0 : i32
    %c0_i32_0 = arith.constant 0 : i32
    %c0_i32_1 = arith.constant 0 : i32
    return %c0_i32, %c0_i32_0 : i32, i32
  }
  func.func @transform_2(%arg0: i32) -> (i32, i32) {
    %c0_i32 = arith.constant 0 : i32
    %c0_i32_0 = arith.constant 0 : i32
    return %arg0, %c0_i32 : i32, i32
  }
}

</mosaic_0001>

<bundles_post_ra>
// kernel: tpu_custom_call.1
= control target key start
LH: loop header
LB: loop body
LE: loop exit
PB: predicated region body
PF: predicated region fallthrough
CT: control target
= control target key end

     0   :  { %7 = vsyncpa [#allocation3], 0  ;;  %s234_s0 = inlined_call_operand.hbm [shape: f32[16,64], index: 0, kind: input, shape index: {}]   ;;  %s235_s1 = inlined_call_operand.hbm [shape: f32[1,64], index: 1, kind: input, shape index: {}]   ;;  %s236_s2 = inlined_call_operand.hbm [shape: f32[16,64], index: 2, kind: output, shape index: {}]  }
   0x1   :  { %8 = vsyncpa [#allocation6], 0 }
   0x2   :  { %9 = vsyncpa [#allocation4], 0  ;;  %s14_s11 = sshll.u32 %s234_s0, 4  ;;  %s195_s12 = smov [#allocation2]   ;;  %s15_s11 = int_to_ptr.hbm [resolvable:$true] %s14_s11 }
   0x3   :  { %s16_s13 = sshll.u32 %s195_s12, 4  ;;  %s28_s16 = sshll.u32 %s235_s1, 4  ;;  %s17_s13 = int_to_ptr.vmem [resolvable:$true] %s16_s13  ;;  %s29_s16 = int_to_ptr.hbm [resolvable:$true] %s28_s16 }
   0x4   :  { %s196_s17 = smov 128   ;;  %s197_s18 = smov 8  }
   0x5   :  { %22 = dma.hbm_to_vmem [thread:$0]  %s15_s11, 256, %s17_s13, [#allocation3], %s196_s17, %s196_s17, %s197_s18  }
   0x6   :  { %s198_s19 = smov [#allocation5]  }
   0x7   :  { %s30_s20 = sshll.u32 %s198_s19, 4  ;;  %s31_s20 = int_to_ptr.vmem [resolvable:$true] %s30_s20 }
   0x8   :  { %33 = dma.hbm_to_vmem [thread:$0]  %s29_s16, 16, %s31_s20, [#allocation6]  }
   0x9   :  { %189 = dma.done.wait [#allocation3], 256  }
   0xa   :  { %190 = vsyncadd [#allocation3], 4294967040 }
   0xb   :  { %191 = dma.done.wait [#allocation6], 16  }
   0xc   :  { %192 = vsyncadd [#allocation6], 4294967280  ;;  %v42_v0 = vld [vmem:[#allocation2] sm:$0xff]  ;;  %vm46_vm0 = vcmask 523264   ;;  %v43_v2 = vld [vmem:[#allocation2 + $0x8] sm:$0xff]  ;;  %s199_s0 = smov [#allocation7]  }
   0xd   :  { %v44_v1 = vmul.f32 %v42_v0, %v42_v0  ;;  %v45_v4 = vmul.f32 %v43_v2, %v43_v2  ;;  %v112_v20 = vld [vmem:[#allocation5] ss:$0 sm:$0xff]  ;;  %s91_s1 = sshll.u32 %s199_s0, 4  ;;  %s93_s23 = sshll.u32 %s236_s2, 4  ;;  %s92_s1 = int_to_ptr.vmem [resolvable:$true] %s91_s1  ;;  %s94_s23 = int_to_ptr.hbm [resolvable:$true] %s93_s23 }
   0xf   :  { %v47_v3 = vsel %vm46_vm0, %v44_v1, 0.0  ;;  %v50_v5 = vsel %vm46_vm0, %v45_v4, 0.0 }
  0x10   :  { %48 = vadd.xlane.f32.xlu0 %v47_v3 }
  0x18   :  { %51 = vadd.xlane.f32.xlu0 %v50_v5 }
  0x83   :  { %v49_v6 = vpop.xlane.xlu0 %48 }
  0x84   :  { %v53_v7 = vmul.f32 0.015625, %v49_v6 }
  0x86   :  { %v55_v8 = vadd.f32 1e-06, %v53_v7 }
  0x88   :  { %113 = vrsqrt.f32 %v55_v8  ;;  %vm63_vm2 = vweird.f32 %v55_v8 }
  0x8b   :  { %v52_v9 = vpop.xlane.xlu0 %51 }
  0x8c   :  { %v54_v10 = vmul.f32 0.015625, %v52_v9 }
  0x8e   :  { %v114_v11 = vpop.eup %113  ;;  %v56_v12 = vadd.f32 1e-06, %v54_v10 }
  0x8f   :  { %v58_v13 = vmul.f32 %v114_v11, %v55_v8  ;;  %vm64_vm1 = vweird.f32 %v114_v11 }
  0x90   :  { %115 = vrsqrt.f32 %v56_v12  ;;  %vm65_vm3 = vmor %vm63_vm2, %vm64_vm1  ;;  %vm73_vm5 = vweird.f32 %v56_v12 }
  0x91   :  { %v59_v14 = vmul.f32 %v114_v11, %v58_v13 }
  0x93   :  { %v60_v15 = vmul.f32 0.5, %v59_v14 }
  0x95   :  { %v61_v16 = vsub.f32 1.5, %v60_v15 }
  0x96   :  { %v116_v17 = vpop.eup %115 }
  0x97   :  { %v62_v18 = vmul.f32 %v114_v11, %v61_v16  ;;  %v68_v19 = vmul.f32 %v116_v17, %v56_v12  ;;  %vm74_vm4 = vweird.f32 %v116_v17 }
  0x98   :  { %vm75_vm6 = vmor %vm73_vm5, %vm74_vm4 }
  0x99   :  { %v66_v21 = vsel %vm65_vm3, %v114_v11, %v62_v18  ;;  %v69_v22 = vmul.f32 %v116_v17, %v68_v19 }
  0x9a   :  { %v78_v23 = vmul.f32 %v66_v21, %v42_v0 }
  0x9b   :  { %v70_v24 = vmul.f32 0.5, %v69_v22 }
  0x9c   :  { %v83_v25 = vmul.f32 %v112_v20, %v78_v23 }
  0x9d   :  { %v71_v26 = vsub.f32 1.5, %v70_v24 }
  0x9e   :  { %85 = vst.msk [vmem:[#allocation7] sm:$0xff] %vm46_vm0, %v83_v25 }
  0x9f   :  { %v72_v27 = vmul.f32 %v116_v17, %v71_v26 }
  0xa1   :  { %v76_v28 = vsel %vm75_vm6, %v116_v17, %v72_v27 }
  0xa2   :  { %v79_v29 = vmul.f32 %v76_v28, %v43_v2 }
  0xa4   :  { %v84_v30 = vmul.f32 %v112_v20, %v79_v29 }
  0xa6   :  { %86 = vst.msk [vmem:[#allocation7 + $0x8] sm:$0xff] %vm46_vm0, %v84_v30 }
  0xa7   :  { %99 = dma.vmem_to_hbm [thread:$0]  %s92_s1, 256, %s94_s23, [#allocation4], %s196_s17, %s196_s17, %s197_s18  }
  0xa8   :  { %193 = dma.done.wait [#allocation4], 256  }
  0xa9   :  { %194 = vsyncadd [#allocation4], 4294967040 }
  0xaa   :  { %104 = vsyncpa [#allocation3], 1 }
  0xab   :  { %105 = vsyncpa [#allocation6], 1 }
  0xac   :  { %106 = vsyncpa [#allocation4], 1 }

</bundles_post_ra>
